<compile_context>
chip_gen: v6e
topology: v6e:2x2x1
jax: 0.10.0
libtpu: 0.0.40
codegen_flags: <defaults>
</compile_context>

<pallas_src>
import math

import jax
import jax.numpy as jnp
from jax.experimental import pallas as pl
from jax.experimental.pallas import tpu as pltpu


def _round_up(x: int, m: int) -> int:
    return ((x + m - 1) // m) * m


def _round_down(x: int, m: int) -> int:
    return (x // m) * m


def _make_packed_kernel(n: int):
    """Kernel for lane-dense layout: each 128-lane row holds 128//n groups."""
    steps = n.bit_length() - 1  # n is a power of two (divides 128)

    def kernel(u_ref, p_ref):
        u = u_ref[...].astype(jnp.float32)           # (tm, 128), f32 internally
        exp_u = jnp.exp(u)                           # EUP
        lane = jax.lax.broadcasted_iota(jnp.int32, exp_u.shape, 1)
        denom = exp_u
        # Segmented all-reduce within each aligned group of n lanes:
        # recursive-doubling butterfly via XLU rolls (exact f32 adds).
        for s in range(steps):
            k = 1 << s
            fwd = pltpu.roll(denom, 128 - k, axis=1)  # value from lane i + k
            bwd = pltpu.roll(denom, k, axis=1)        # value from lane i - k
            partner = jnp.where((lane & k) == 0, fwd, bwd)
            denom = denom + partner
        p = exp_u * pl.reciprocal(denom, approx=False)
        p_ref[...] = p.astype(p_ref.dtype)

    return kernel


def _rows_kernel(u_ref, p_ref):
    """Fallback kernel: one softmax group per row (lane-dense when N >= 128)."""
    u = u_ref[...].astype(jnp.float32)
    exp_u = jnp.exp(u)
    denom = jnp.sum(exp_u, axis=-1, keepdims=True)
    p_ref[...] = (exp_u * pl.reciprocal(denom, approx=False)).astype(p_ref.dtype)


def logit_layer(utility: jax.Array, *, min_pallas_elements: int = 1024) -> jax.Array:
    """Pallas TPU implementation of LogitLayer.forward."""
    orig_shape = utility.shape
    orig_dtype = utility.dtype
    n = orig_shape[-1]
    m = 1
    for d in orig_shape[:-1]:
        m *= d
    total = m * n

    # Tiny inputs: kernel launch + DMA setup dwarfs the compute; plain XLA wins.
    if total == 0 or total < min_pallas_elements:
        exp_u = jnp.exp(utility.astype(jnp.float32))
        p = exp_u / jnp.sum(exp_u, axis=-1, keepdims=True)
        return p.astype(orig_dtype)

    u2d = utility.reshape(m, n)
    row_align = 8 if jnp.dtype(orig_dtype).itemsize >= 4 else 16
    compiler_params = pltpu.CompilerParams(dimension_semantics=("parallel",))

    if n < 128 and 128 % n == 0:
        # ---- lane-dense packed path: 128//n groups per vreg row ----
        g = 128 // n
        m_pack = pl.cdiv(m, g)
        tm = min(1024, _round_up(m_pack, row_align))   # 1024*128*4B = 512 KiB/block
        m_pack_pad = _round_up(m_pack, tm)

        flat = u2d.reshape(-1)
        pad = m_pack_pad * 128 - total
        if pad:
            # Zero padding forms complete groups of zeros at the end
            # (exp(0)=1, denom=n): no NaNs, padded rows are discarded below.
            flat = jnp.pad(flat, (0, pad))
        u_packed = flat.reshape(m_pack_pad, 128)

        grid = (m_pack_pad // tm,)
        probs_packed = pl.pallas_call(
            _make_packed_kernel(n),
            out_shape=jax.ShapeDtypeStruct((m_pack_pad, 128), orig_dtype),
            grid_spec=pltpu.PrefetchScalarGridSpec(
                num_scalar_prefetch=0,
                grid=grid,
                in_specs=[pl.BlockSpec((tm, 128), lambda i: (i, 0))],
                out_specs=pl.BlockSpec((tm, 128), lambda i: (i, 0)),
            ),
            compiler_params=compiler_params,
        )(u_packed)
        return probs_packed.reshape(-1)[:total].reshape(orig_shape)

    # ---- fallback path: one softmax group per block row ----
    # Size blocks to ~2 MiB (x4 for in+out double-buffering stays well under
    # the scoped VMEM limit on every generation, including v7x).
    target_bytes = 2 * 1024 * 1024
    rows_fit = max(row_align, _round_down(target_bytes // (n * 4), row_align))
    tm = max(row_align, min(rows_fit, _round_up(m, row_align)))
    m_pad = _round_up(m, tm)
    u_p = u2d if m_pad == m else jnp.pad(u2d, ((0, m_pad - m), (0, 0)))

    grid = (m_pad // tm,)
    probs2d = pl.pallas_call(
        _rows_kernel,
        out_shape=jax.ShapeDtypeStruct((m_pad, n), orig_dtype),
        grid_spec=pltpu.PrefetchScalarGridSpec(
            num_scalar_prefetch=0,
            grid=grid,
            in_specs=[pl.BlockSpec((tm, n), lambda i: (i, 0))],
            out_specs=pl.BlockSpec((tm, n), lambda i: (i, 0)),
        ),
        compiler_params=compiler_params,
    )(u_p)
    return probs2d[:m].reshape(orig_shape)


if __name__ == "__main__":
    key = jax.random.PRNGKey(0)
    k1, k2, k3, k4 = jax.random.split(key, 4)

    tests = [
        # (name, utility) — small shapes consistent with a logit choice model.
        ("packed_2d", jax.random.normal(k1, (2048, 8), jnp.float32)),
        ("packed_3d", jax.random.normal(k2, (2, 300, 8), jnp.float32)),
        ("rows_fallback", jax.random.normal(k3, (500, 12), jnp.float32)),
        ("tiny_jnp_path", jax.random.normal(k4, (16, 8), jnp.float32)),
    ]

    for name, u in tests:
        p = jax.block_until_ready(logit_layer(u))
        exp_u = jnp.exp(u.astype(jnp.float32))
        ref = exp_u / jnp.sum(exp_u, axis=-1, keepdims=True)
        assert p.shape == u.shape, name
        assert p.dtype == u.dtype, name
        assert jnp.allclose(p.astype(jnp.float32), ref, atol=1e-5, rtol=1e-5), name
        assert jnp.allclose(jnp.sum(p, axis=-1), 1.0, atol=1e-4), name

    # bf16 input: kernel upcasts to f32 internally, casts back on store.
    u_bf16 = jax.random.normal(k1, (1024, 8), jnp.float32).astype(jnp.bfloat16)
    p_bf16 = jax.block_until_ready(logit_layer(u_bf16))
    exp_u = jnp.exp(u_bf16.astype(jnp.float32))
    ref = exp_u / jnp.sum(exp_u, axis=-1, keepdims=True)
    assert p_bf16.dtype == jnp.bfloat16
    assert jnp.allclose(p_bf16.astype(jnp.float32), ref, atol=1e-2, rtol=1e-2)

    # NOTE: no max-subtraction before exp (matches the torch reference exactly);
    # utilities > ~88 in f32 will overflow to inf -> NaN, as in the original.
    print("KERNEL_OK")
</pallas_src>

<mosaic_0001>
module attributes {stable_mosaic.version = 11 : i64} {
  func.func @kernel(%arg0: i32, %arg1: memref<128x128xf32, #tpu.memory_space<vmem>>, %arg2: memref<128x128xf32, #tpu.memory_space<vmem>>) attributes {dimension_semantics = [#tpu.dimension_semantics<parallel>], iteration_bounds = array<i64: 1>, scalar_prefetch = 0 : i64, scratch_operands = 0 : i64, tpu.core_type = #tpu.core_type<tc>, window_params = [{transform_indices = @transform_0, window_bounds = array<i64: 128, 128>}, {transform_indices = @transform_1, window_bounds = array<i64: 128, 128>}]} {
    %c0 = arith.constant 0 : index
    %c0_0 = arith.constant 0 : index
    %0 = vector.load %arg1[%c0, %c0_0] : memref<128x128xf32, #tpu.memory_space<vmem>>, vector<128x128xf32>
    %1 = math.exp %0 : vector<128x128xf32>
    %2 = tpu.iota {dimensions = array<i32: 1>} : vector<128x128xi32>
    %c127_i32 = arith.constant 127 : i32
    %3 = tpu.dynamic_rotate %1 by %c127_i32 dim 1 : vector<128x128xf32>, i32 -> vector<128x128xf32>
    %c1_i32 = arith.constant 1 : i32
    %4 = tpu.dynamic_rotate %1 by %c1_i32 dim 1 : vector<128x128xf32>, i32 -> vector<128x128xf32>
    %c1_i32_1 = arith.constant 1 : i32
    %5 = vector.broadcast %c1_i32_1 : i32 to vector<128x128xi32>
    %6 = arith.andi %2, %5 : vector<128x128xi32>
    %c0_i32 = arith.constant 0 : i32
    %7 = vector.broadcast %c0_i32 : i32 to vector<128x128xi32>
    %8 = arith.cmpi eq, %6, %7 : vector<128x128xi32>
    %9 = arith.select %8, %3, %4 : vector<128x128xi1>, vector<128x128xf32>
    %10 = arith.addf %1, %9 : vector<128x128xf32>
    %c126_i32 = arith.constant 126 : i32
    %11 = tpu.dynamic_rotate %10 by %c126_i32 dim 1 : vector<128x128xf32>, i32 -> vector<128x128xf32>
    %c2_i32 = arith.constant 2 : i32
    %12 = tpu.dynamic_rotate %10 by %c2_i32 dim 1 : vector<128x128xf32>, i32 -> vector<128x128xf32>
    %c2_i32_2 = arith.constant 2 : i32
    %13 = vector.broadcast %c2_i32_2 : i32 to vector<128x128xi32>
    %14 = arith.andi %2, %13 : vector<128x128xi32>
    %c0_i32_3 = arith.constant 0 : i32
    %15 = vector.broadcast %c0_i32_3 : i32 to vector<128x128xi32>
    %16 = arith.cmpi eq, %14, %15 : vector<128x128xi32>
    %17 = arith.select %16, %11, %12 : vector<128x128xi1>, vector<128x128xf32>
    %18 = arith.addf %10, %17 : vector<128x128xf32>
    %c124_i32 = arith.constant 124 : i32
    %19 = tpu.dynamic_rotate %18 by %c124_i32 dim 1 : vector<128x128xf32>, i32 -> vector<128x128xf32>
    %c4_i32 = arith.constant 4 : i32
    %20 = tpu.dynamic_rotate %18 by %c4_i32 dim 1 : vector<128x128xf32>, i32 -> vector<128x128xf32>
    %c4_i32_4 = arith.constant 4 : i32
    %21 = vector.broadcast %c4_i32_4 : i32 to vector<128x128xi32>
    %22 = arith.andi %2, %21 : vector<128x128xi32>
    %c0_i32_5 = arith.constant 0 : i32
    %23 = vector.broadcast %c0_i32_5 : i32 to vector<128x128xi32>
    %24 = arith.cmpi eq, %22, %23 : vector<128x128xi32>
    %25 = arith.select %24, %19, %20 : vector<128x128xi1>, vector<128x128xf32>
    %26 = arith.addf %18, %25 : vector<128x128xf32>
    %27 = tpu.reciprocal %26 : vector<128x128xf32> -> vector<128x128xf32>
    %28 = arith.mulf %1, %27 : vector<128x128xf32>
    %c0_6 = arith.constant 0 : index
    %c0_7 = arith.constant 0 : index
    %29 = vector.load %arg2[%c0_6, %c0_7] : memref<128x128xf32, #tpu.memory_space<vmem>>, vector<128x128xf32>
    tpu.vector_store %arg2[%c0_6, %c0_7], %28 {strides = array<i32>} : memref<128x128xf32, #tpu.memory_space<vmem>>, vector<128x128xf32>,
    return
  }
  func.func @transform_0(%arg0: i32) -> (i32, i32) {
    %c0_i32 = arith.constant 0 : i32
    %c0_i32_0 = arith.constant 0 : i32
    return %arg0, %c0_i32 : i32, i32
  }
  func.func @transform_1(%arg0: i32) -> (i32, i32) {
    %c0_i32 = arith.constant 0 : i32
    %c0_i32_0 = arith.constant 0 : i32
    return %arg0, %c0_i32 : i32, i32
  }
}

</mosaic_0001>

<bundles_post_ra>
// kernel: tpu_custom_call.1
= control target key start
LH: loop header
LB: loop body
LE: loop exit
PB: predicated region body
PF: predicated region fallthrough
CT: control target
= control target key end

     0   :  { %6 = vsyncpa [#allocation3], 0  ;;  %s1026_s0 = inlined_call_operand.hbm [shape: f32[128,128], index: 0, kind: input, shape index: {}]   ;;  %s1027_s1 = inlined_call_operand.hbm [shape: f32[128,128], index: 1, kind: output, shape index: {}]  }
   0x1   :  { %7 = vsyncpa [#allocation4], 0  ;;  %s550_s6 = smov [#allocation2]  }
   0x2   :  { %s13_s7 = sshll.u32 %s550_s6, 4  ;;  %s14_s7 = int_to_ptr.vmem [resolvable:$true] %s13_s7 }
   0x3   :  { %s514_s8 = scalar_lea.vmem %s14_s7, 2048  ;;  %p519_p1 = scmp.lt.s32.totalorder %s14_s7, %s14_s7 }
   0x4   :  { %p515_p0 = scmp.ne.s32.totalorder %s14_s7, %s514_s8  ;;  %p520_p2 = scmp.lt.s32.totalorder %s514_s8, %s514_s8 }
   0x6   :  { %p521_p3 = por %p520_p2, %p519_p1 }
   0x8   :  { %p522_p4 = pnand %p521_p3, %p515_p0 }
   0xa   :  { %525 = shalt.err (!%p522_p4)
}
   0xb   :  { %s551_s9 = smov 128   ;;  %s552_s10 = smov 8  }
   0xc   :  { %19 = dma.hbm_to_vmem [thread:$0]  %s1026_s0, 2048, %s14_s7, [#allocation3], %s551_s9, %s551_s9, %s552_s10  }
   0xd   :  { %546 = dma.done.wait [#allocation3], 2048  }
   0xe   :  { %547 = vsyncadd [#allocation3], 4294965248  ;;  %v25_v0 = vld [vmem:[#allocation2 + $0x10] sm:$0xff]  ;;  %v23_v1 = vld [vmem:[#allocation2] sm:$0xff]  ;;  %s553_s0 = smov 127   ;;  %s554_s13 = smov 1   ;;  %v71_v58 = vlaneseq }
   0xf   :  { %v26_v2 = vld [vmem:[#allocation2 + $0x18] sm:$0xff]  ;;  %v43_v3 = vmul.f32 1.442695, %v25_v0  ;;  %v39_v4 = vmul.f32 1.442695, %v23_v1  ;;  %v24_v6 = vld [vmem:[#allocation2 + $0x8] sm:$0xff] }
  0x10   :  { %v45_v5 = vmul.f32 1.442695, %v26_v2  ;;  %v28_v7 = vld [vmem:[#allocation2 + $0x28] sm:$0xff]  ;;  %v41_v8 = vmul.f32 1.442695, %v24_v6  ;;  %v27_v9 = vld [vmem:[#allocation2 + $0x20] sm:$0xff] }
  0x11   :  { %442 = vpow2.f32 %v43_v3  ;;  %v49_v10 = vmul.f32 1.442695, %v28_v7  ;;  %v47_v11 = vmul.f32 1.442695, %v27_v9  ;;  %v30_v12 = vld [vmem:[#allocation2 + $0x38] sm:$0xff]  ;;  %v29_v13 = vld [vmem:[#allocation2 + $0x30] sm:$0xff] }
  0x12   :  { %444 = vpow2.f32 %v39_v4  ;;  %v53_v14 = vmul.f32 1.442695, %v30_v12  ;;  %v51_v15 = vmul.f32 1.442695, %v29_v13  ;;  %v32_v16 = vld [vmem:[#allocation2 + $0x48] sm:$0xff]  ;;  %v31_v17 = vld [vmem:[#allocation2 + $0x40] sm:$0xff] }
  0x13   :  { %446 = vpow2.f32 %v45_v5  ;;  %v57_v18 = vmul.f32 1.442695, %v32_v16  ;;  %v55_v19 = vmul.f32 1.442695, %v31_v17  ;;  %v34_v20 = vld [vmem:[#allocation2 + $0x58] sm:$0xff]  ;;  %v33_v21 = vld [vmem:[#allocation2 + $0x50] sm:$0xff] }
  0x14   :  { %448 = vpow2.f32 %v41_v8  ;;  %v61_v24 = vmul.f32 1.442695, %v34_v20  ;;  %v59_v26 = vmul.f32 1.442695, %v33_v21  ;;  %v36_v27 = vld [vmem:[#allocation2 + $0x68] sm:$0xff]  ;;  %v35_v29 = vld [vmem:[#allocation2 + $0x60] sm:$0xff] }
  0x15   :  { %450 = vpow2.f32 %v49_v10  ;;  %v65_v30 = vmul.f32 1.442695, %v36_v27  ;;  %v63_v32 = vmul.f32 1.442695, %v35_v29  ;;  %v38_v33 = vld [vmem:[#allocation2 + $0x78] sm:$0xff]  ;;  %v37_v35 = vld [vmem:[#allocation2 + $0x70] sm:$0xff] }
  0x16   :  { %452 = vpow2.f32 %v47_v11  ;;  %v69_v36 = vmul.f32 1.442695, %v38_v33  ;;  %v67_v38 = vmul.f32 1.442695, %v37_v35  ;;  %v656_v61 = vand.u32 127, %v71_v58  ;;  %s555_s14 = smov 126  }
  0x17   :  { %454 = vpow2.f32 %v53_v14  ;;  %s556_s15 = smov 2   ;;  %s557_s16 = smov 124  }
  0x18   :  { %456 = vpow2.f32 %v51_v15  ;;  %v137_v0 = vand.u32 1, %v656_v61  ;;  %s558_s17 = smov 4   ;;  %s559_s18 = smov [#allocation5]  }
  0x19   :  { %458 = vpow2.f32 %v57_v18  ;;  %s420_s19 = sshll.u32 %s559_s18, 4  ;;  %s421_s19 = int_to_ptr.vmem [resolvable:$true] %s420_s19 }
  0x1a   :  { %460 = vpow2.f32 %v55_v19  ;;  %vm663_vm0 = vcmp.eq.s32.totalorder %v137_v0, 0  ;;  %s526_s20 = scalar_lea.vmem %s421_s19, 2048  ;;  %p531_p6 = scmp.lt.s32.totalorder %s421_s19, %s421_s19 }
  0x1b   :  { %462 = vpow2.f32 %v61_v24  ;;  %p527_p5 = scmp.ne.s32.totalorder %s421_s19, %s526_s20  ;;  %p532_p7 = scmp.lt.s32.totalorder %s526_s20, %s526_s20 }
  0x1c   :  { %464 = vpow2.f32 %v59_v26 }
  0x1d   :  { %466 = vpow2.f32 %v65_v30  ;;  %p533_p8 = por %p532_p7, %p531_p6 }
  0x1e   :  { %v576_v22 = vpop.eup %442  ;;  %468 = vpow2.f32 %v63_v32 }
  0x1f   :  { %v578_v23 = vpop.eup %444  ;;  %77 = vrot.lane.b32.xlu1 %v576_v22, %s553_s0  ;;  %470 = vpow2.f32 %v69_v36  ;;  %p534_p9 = pnand %p533_p8, %p527_p5 }
  0x20   :  { %v582_v25 = vpop.eup %446  ;;  %73 = vrot.lane.b32.xlu0 %v578_v23, %s553_s0  ;;  %472 = vpow2.f32 %v67_v38 }
  0x21   :  { %v586_v28 = vpop.eup %448 }
  0x22   :  { %v590_v31 = vpop.eup %450 }
  0x23   :  { %79 = vrot.lane.b32.xlu1 %v582_v25, %s553_s0  ;;  %v594_v34 = vpop.eup %452 }
  0x24   :  { %75 = vrot.lane.b32.xlu0 %v586_v28, %s553_s0  ;;  %v598_v37 = vpop.eup %454 }
  0x25   :  { %v602_v39 = vpop.eup %456 }
  0x26   :  { %v606_v40 = vpop.eup %458 }
  0x27   :  { %83 = vrot.lane.b32.xlu1 %v590_v31, %s553_s0  ;;  %v610_v41 = vpop.eup %460 }
  0x28   :  { %81 = vrot.lane.b32.xlu0 %v594_v34, %s553_s0  ;;  %v614_v42 = vpop.eup %462 }
  0x29   :  { %v618_v43 = vpop.eup %464 }
  0x2a   :  { %v622_v44 = vpop.eup %466 }
  0x2b   :  { %87 = vrot.lane.b32.xlu1 %v598_v37, %s553_s0  ;;  %v626_v45 = vpop.eup %468 }
  0x2c   :  { %85 = vrot.lane.b32.xlu0 %v602_v39, %s553_s0  ;;  %v630_v46 = vpop.eup %470 }
  0x2d   :  { %v634_v47 = vpop.eup %472 }
  0x2f   :  { %91 = vrot.lane.b32.xlu1 %v606_v40, %s553_s0 }
  0x30   :  { %89 = vrot.lane.b32.xlu0 %v610_v41, %s553_s0 }
  0x33   :  { %95 = vrot.lane.b32.xlu1 %v614_v42, %s553_s0 }
  0x34   :  { %93 = vrot.lane.b32.xlu0 %v618_v43, %s553_s0 }
  0x37   :  { %99 = vrot.lane.b32.xlu1 %v622_v44, %s553_s0 }
  0x38   :  { %97 = vrot.lane.b32.xlu0 %v626_v45, %s553_s0 }
  0x3b   :  { %103 = vrot.lane.b32.xlu1 %v630_v46, %s553_s0 }
  0x3c   :  { %101 = vrot.lane.b32.xlu0 %v634_v47, %s553_s0 }
  0x3f   :  { %107 = vrot.lane.b32.xlu1 %v586_v28, %s554_s13 }
  0x40   :  { %105 = vrot.lane.b32.xlu0 %v578_v23, %s554_s13 }
  0x43   :  { %111 = vrot.lane.b32.xlu1 %v582_v25, %s554_s13 }
  0x44   :  { %109 = vrot.lane.b32.xlu0 %v576_v22, %s554_s13 }
  0x47   :  { %115 = vrot.lane.b32.xlu1 %v590_v31, %s554_s13 }
  0x48   :  { %113 = vrot.lane.b32.xlu0 %v594_v34, %s554_s13 }
  0x4b   :  { %119 = vrot.lane.b32.xlu1 %v598_v37, %s554_s13 }
  0x4c   :  { %117 = vrot.lane.b32.xlu0 %v602_v39, %s554_s13 }
  0x4f   :  { %123 = vrot.lane.b32.xlu1 %v606_v40, %s554_s13 }
  0x50   :  { %121 = vrot.lane.b32.xlu0 %v610_v41, %s554_s13 }
  0x53   :  { %127 = vrot.lane.b32.xlu1 %v614_v42, %s554_s13 }
  0x54   :  { %125 = vrot.lane.b32.xlu0 %v618_v43, %s554_s13 }
  0x57   :  { %131 = vrot.lane.b32.xlu1 %v622_v44, %s554_s13 }
  0x58   :  { %129 = vrot.lane.b32.xlu0 %v626_v45, %s554_s13 }
  0x5b   :  { %135 = vrot.lane.b32.xlu1 %v630_v46, %s554_s13 }
  0x5c   :  { %133 = vrot.lane.b32.xlu0 %v634_v47, %s554_s13 }
  0x91   :  { %v78_v48 = vpop.permute.xlu1 %77 }
  0x92   :  { %v74_v49 = vpop.permute.xlu0 %73 }
  0x95   :  { %v80_v50 = vpop.permute.xlu1 %79 }
  0x96   :  { %v76_v51 = vpop.permute.xlu0 %75 }
  0x99   :  { %v84_v52 = vpop.permute.xlu1 %83 }
  0x9a   :  { %v82_v53 = vpop.permute.xlu0 %81 }
  0x9d   :  { %v88_v54 = vpop.permute.xlu1 %87 }
  0x9e   :  { %v86_v55 = vpop.permute.xlu0 %85 }
  0xa1   :  { %v92_v56 = vpop.permute.xlu1 %91 }
  0xa2   :  { %v90_v57 = vpop.permute.xlu0 %89 }
  0xa5   :  { %v96_v59 = vpop.permute.xlu1 %95 }
  0xa6   :  { %v94_v60 = vpop.permute.xlu0 %93 }
  0xa9   :  { %v100_v62 = vpop.permute.xlu1 %99 }
  0xaa   :  { %v98_v63 = vpop.permute.xlu0 %97 }
  0xad   :  { %v659_v1 = vpop.permute.xlu1 %103 }
  0xae   :  { %v661_v2 = vpop.permute.xlu0 %101 }
  0xb1   :  { %v108_v4 = vpop.permute.xlu1 %107 }
  0xb2   :  { %v140_v5 = vsel %vm663_vm0, %v76_v51, %v108_v4  ;;  %v106_v6 = vpop.permute.xlu0 %105 }
  0xb3   :  { %v670_v7 = vadd.f32 %v586_v28, %v140_v5  ;;  %v139_v8 = vsel %vm663_vm0, %v74_v49, %v106_v6 }
  0xb4   :  { %v675_v9 = vadd.f32 %v578_v23, %v139_v8 }
  0xb5   :  { %v112_v10 = vpop.permute.xlu1 %111  ;;  %173 = vrot.lane.b32.xlu1 %v670_v7, %s555_s14 }
  0xb6   :  { %v142_v11 = vsel %vm663_vm0, %v80_v50, %v112_v10  ;;  %171 = vrot.lane.b32.xlu0 %v675_v9, %s555_s14  ;;  %v110_v12 = vpop.permute.xlu0 %109 }
  0xb7   :  { %v684_v13 = vadd.f32 %v582_v25, %v142_v11  ;;  %v141_v14 = vsel %vm663_vm0, %v78_v48, %v110_v12 }
  0xb8   :  { %v689_v15 = vadd.f32 %v576_v22, %v141_v14 }
  0xb9   :  { %v116_v16 = vpop.permute.xlu1 %115  ;;  %177 = vrot.lane.b32.xlu1 %v684_v13, %s555_s14 }
  0xba   :  { %v144_v17 = vsel %vm663_vm0, %v84_v52, %v116_v16  ;;  %175 = vrot.lane.b32.xlu0 %v689_v15, %s555_s14  ;;  %v114_v18 = vpop.permute.xlu0 %113 }
  0xbb   :  { %v698_v19 = vadd.f32 %v590_v31, %v144_v17  ;;  %v143_v20 = vsel %vm663_vm0, %v82_v53, %v114_v18 }
  0xbc   :  { %v703_v21 = vadd.f32 %v594_v34, %v143_v20 }
  0xbd   :  { %v120_v24 = vpop.permute.xlu1 %119  ;;  %181 = vrot.lane.b32.xlu1 %v698_v19, %s555_s14 }
  0xbe   :  { %v146_v26 = vsel %vm663_vm0, %v88_v54, %v120_v24  ;;  %179 = vrot.lane.b32.xlu0 %v703_v21, %s555_s14  ;;  %v118_v27 = vpop.permute.xlu0 %117 }
  0xbf   :  { %v712_v29 = vadd.f32 %v598_v37, %v146_v26  ;;  %v145_v30 = vsel %vm663_vm0, %v86_v55, %v118_v27 }
  0xc0   :  { %v717_v32 = vadd.f32 %v602_v39, %v145_v30  ;;  %v235_v30 = vand.u32 2, %v656_v61 }
  0xc1   :  { %v124_v33 = vpop.permute.xlu1 %123  ;;  %185 = vrot.lane.b32.xlu1 %v712_v29, %s555_s14 }
  0xc2   :  { %v148_v35 = vsel %vm663_vm0, %v92_v56, %v124_v33  ;;  %183 = vrot.lane.b32.xlu0 %v717_v32, %s555_s14  ;;  %v122_v36 = vpop.permute.xlu0 %121  ;;  %vm802_vm1 = vcmp.eq.s32.totalorder %v235_v30, 0 }
  0xc3   :  { %v726_v38 = vadd.f32 %v606_v40, %v148_v35  ;;  %v147_v48 = vsel %vm663_vm0, %v90_v57, %v122_v36 }
  0xc4   :  { %v731_v49 = vadd.f32 %v610_v41, %v147_v48 }
  0xc5   :  { %v128_v50 = vpop.permute.xlu1 %127  ;;  %189 = vrot.lane.b32.xlu1 %v726_v38, %s555_s14 }
  0xc6   :  { %v150_v51 = vsel %vm663_vm0, %v96_v59, %v128_v50  ;;  %187 = vrot.lane.b32.xlu0 %v731_v49, %s555_s14  ;;  %v126_v52 = vpop.permute.xlu0 %125 }
  0xc7   :  { %v740_v53 = vadd.f32 %v614_v42, %v150_v51  ;;  %v149_v54 = vsel %vm663_vm0, %v94_v60, %v126_v52 }
  0xc8   :  { %v745_v55 = vadd.f32 %v618_v43, %v149_v54 }
  0xc9   :  { %v132_v56 = vpop.permute.xlu1 %131  ;;  %193 = vrot.lane.b32.xlu1 %v740_v53, %s555_s14 }
  0xca   :  { %v152_v57 = vsel %vm663_vm0, %v100_v62, %v132_v56  ;;  %191 = vrot.lane.b32.xlu0 %v745_v55, %s555_s14  ;;  %v130_v58 = vpop.permute.xlu0 %129 }
  0xcb   :  { %v754_v59 = vadd.f32 %v622_v44, %v152_v57  ;;  %v151_v60 = vsel %vm663_vm0, %v98_v63, %v130_v58 }
  0xcc   :  { %v759_v0 = vadd.f32 %v626_v45, %v151_v60 }
  0xcd   :  { %v136_v4 = vpop.permute.xlu1 %135  ;;  %197 = vrot.lane.b32.xlu1 %v754_v59, %s555_s14 }
  0xce   :  { %v154_v62 = vsel %vm663_vm0, %v659_v1, %v136_v4  ;;  %195 = vrot.lane.b32.xlu0 %v759_v0, %s555_s14  ;;  %v134_v5 = vpop.permute.xlu0 %133 }
  0xcf   :  { %v769_v6 = vadd.f32 %v630_v46, %v154_v62  ;;  %v153_v63 = vsel %vm663_vm0, %v661_v2, %v134_v5 }
  0xd0   :  { %v775_v8 = vadd.f32 %v634_v47, %v153_v63 }
  0xd1   :  { %201 = vrot.lane.b32.xlu1 %v769_v6, %s555_s14 }
  0xd2   :  { %199 = vrot.lane.b32.xlu0 %v775_v8, %s555_s14 }
  0xd5   :  { %205 = vrot.lane.b32.xlu1 %v670_v7, %s556_s15 }
  0xd6   :  { %203 = vrot.lane.b32.xlu0 %v675_v9, %s556_s15 }
  0xd9   :  { %209 = vrot.lane.b32.xlu1 %v684_v13, %s556_s15 }
  0xda   :  { %207 = vrot.lane.b32.xlu0 %v689_v15, %s556_s15 }
  0xdd   :  { %213 = vrot.lane.b32.xlu1 %v698_v19, %s556_s15 }
  0xde   :  { %211 = vrot.lane.b32.xlu0 %v703_v21, %s556_s15 }
  0xe1   :  { %217 = vrot.lane.b32.xlu1 %v712_v29, %s556_s15 }
  0xe2   :  { %215 = vrot.lane.b32.xlu0 %v717_v32, %s556_s15 }
  0xe5   :  { %221 = vrot.lane.b32.xlu1 %v726_v38, %s556_s15 }
  0xe6   :  { %219 = vrot.lane.b32.xlu0 %v731_v49, %s556_s15 }
  0xe9   :  { %225 = vrot.lane.b32.xlu1 %v740_v53, %s556_s15 }
  0xea   :  { %223 = vrot.lane.b32.xlu0 %v745_v55, %s556_s15 }
  0xed   :  { %229 = vrot.lane.b32.xlu1 %v754_v59, %s556_s15 }
  0xee   :  { %227 = vrot.lane.b32.xlu0 %v759_v0, %s556_s15 }
  0xf1   :  { %233 = vrot.lane.b32.xlu1 %v769_v6, %s556_s15 }
  0xf2   :  { %231 = vrot.lane.b32.xlu0 %v775_v8, %s556_s15 }
 0x127   :  { %v174_v1 = vpop.permute.xlu1 %173 }
 0x128   :  { %v172_v2 = vpop.permute.xlu0 %171 }
 0x12b   :  { %v178_v3 = vpop.permute.xlu1 %177 }
 0x12c   :  { %v176_v10 = vpop.permute.xlu0 %175 }
 0x12f   :  { %v182_v11 = vpop.permute.xlu1 %181 }
 0x130   :  { %v180_v12 = vpop.permute.xlu0 %179 }
 0x133   :  { %v186_v14 = vpop.permute.xlu1 %185 }
 0x134   :  { %v184_v16 = vpop.permute.xlu0 %183 }
 0x137   :  { %v190_v17 = vpop.permute.xlu1 %189 }
 0x138   :  { %v188_v18 = vpop.permute.xlu0 %187 }
 0x13b   :  { %v194_v20 = vpop.permute.xlu1 %193 }
 0x13c   :  { %v192_v24 = vpop.permute.xlu0 %191 }
 0x13f   :  { %v198_v26 = vpop.permute.xlu1 %197 }
 0x140   :  { %v196_v27 = vpop.permute.xlu0 %195 }
 0x143   :  { %v798_v33 = vpop.permute.xlu1 %201 }
 0x144   :  { %v800_v35 = vpop.permute.xlu0 %199 }
 0x147   :  { %v206_v48 = vpop.permute.xlu1 %205 }
 0x148   :  { %v238_v50 = vsel %vm802_vm1, %v174_v1, %v206_v48  ;;  %v204_v51 = vpop.permute.xlu0 %203 }
 0x149   :  { %v809_v52 = vadd.f32 %v238_v50, %v670_v7  ;;  %v237_v54 = vsel %vm802_vm1, %v172_v2, %v204_v51 }
 0x14a   :  { %v814_v56 = vadd.f32 %v237_v54, %v675_v9 }
 0x14b   :  { %271 = vrot.lane.b32.xlu1 %v809_v52, %s557_s16  ;;  %v210_v57 = vpop.permute.xlu1 %209 }
 0x14c   :  { %v240_v58 = vsel %vm802_vm1, %v178_v3, %v210_v57  ;;  %269 = vrot.lane.b32.xlu0 %v814_v56, %s557_s16  ;;  %v208_v60 = vpop.permute.xlu0 %207 }
 0x14d   :  { %v823_v7 = vadd.f32 %v240_v58, %v684_v13  ;;  %v239_v4 = vsel %vm802_vm1, %v176_v10, %v208_v60 }
 0x14e   :  { %v828_v9 = vadd.f32 %v239_v4, %v689_v15 }
 0x14f   :  { %275 = vrot.lane.b32.xlu1 %v823_v7, %s557_s16  ;;  %v214_v62 = vpop.permute.xlu1 %213 }
 0x150   :  { %v242_v5 = vsel %vm802_vm1, %v182_v11, %v214_v62  ;;  %273 = vrot.lane.b32.xlu0 %v828_v9, %s557_s16  ;;  %v212_v63 = vpop.permute.xlu0 %211 }
 0x151   :  { %v837_v13 = vadd.f32 %v242_v5, %v698_v19  ;;  %v241_v1 = vsel %vm802_vm1, %v180_v12, %v212_v63 }
 0x152   :  { %v842_v15 = vadd.f32 %v241_v1, %v703_v21 }
 0x153   :  { %279 = vrot.lane.b32.xlu1 %v837_v13, %s557_s16  ;;  %v218_v2 = vpop.permute.xlu1 %217 }
 0x154   :  { %v244_v3 = vsel %vm802_vm1, %v186_v14, %v218_v2  ;;  %277 = vrot.lane.b32.xlu0 %v842_v15, %s557_s16  ;;  %v216_v10 = vpop.permute.xlu0 %215 }
 0x155   :  { %v851_v19 = vadd.f32 %v244_v3, %v712_v29  ;;  %v243_v11 = vsel %vm802_vm1, %v184_v16, %v216_v10 }
 0x156   :  { %v856_v21 = vadd.f32 %v243_v11, %v717_v32  ;;  %v333_v11 = vand.u32 4, %v656_v61 }
 0x157   :  { %283 = vrot.lane.b32.xlu1 %v851_v19, %s557_s16  ;;  %v222_v12 = vpop.permute.xlu1 %221 }
 0x158   :  { %v246_v14 = vsel %vm802_vm1, %v190_v17, %v222_v12  ;;  %281 = vrot.lane.b32.xlu0 %v856_v21, %s557_s16  ;;  %v220_v30 = vpop.permute.xlu0 %219  ;;  %vm947_vm2 = vcmp.eq.s32.totalorder %v333_v11, 0 }
 0x159   :  { %v865_v29 = vadd.f32 %v246_v14, %v726_v38  ;;  %v245_v16 = vsel %vm802_vm1, %v188_v18, %v220_v30 }
 0x15a   :  { %v870_v32 = vadd.f32 %v245_v16, %v731_v49 }
 0x15b   :  { %287 = vrot.lane.b32.xlu1 %v865_v29, %s557_s16  ;;  %v226_v48 = vpop.permute.xlu1 %225 }
 0x15c   :  { %v248_v17 = vsel %vm802_vm1, %v194_v20, %v226_v48  ;;  %285 = vrot.lane.b32.xlu0 %v870_v32, %s557_s16  ;;  %v224_v50 = vpop.permute.xlu0 %223 }
 0x15d   :  { %v879_v38 = vadd.f32 %v248_v17, %v740_v53  ;;  %v247_v18 = vsel %vm802_vm1, %v192_v24, %v224_v50 }
 0x15e   :  { %v884_v49 = vadd.f32 %v247_v18, %v745_v55 }
 0x15f   :  { %291 = vrot.lane.b32.xlu1 %v879_v38, %s557_s16  ;;  %v230_v51 = vpop.permute.xlu1 %229 }
 0x160   :  { %v250_v20 = vsel %vm802_vm1, %v198_v26, %v230_v51  ;;  %289 = vrot.lane.b32.xlu0 %v884_v49, %s557_s16  ;;  %v228_v54 = vpop.permute.xlu0 %227 }
 0x161   :  { %v893_v53 = vadd.f32 %v250_v20, %v754_v59  ;;  %v249_v24 = vsel %vm802_vm1, %v196_v27, %v228_v54 }
 0x162   :  { %v898_v55 = vadd.f32 %v249_v24, %v759_v0 }
 0x163   :  { %295 = vrot.lane.b32.xlu1 %v893_v53, %s557_s16  ;;  %v234_v57 = vpop.permute.xlu1 %233 }
 0x164   :  { %v252_v26 = vsel %vm802_vm1, %v798_v33, %v234_v57  ;;  %293 = vrot.lane.b32.xlu0 %v898_v55, %s557_s16  ;;  %v232_v58 = vpop.permute.xlu0 %231 }
 0x165   :  { %v908_v59 = vadd.f32 %v252_v26, %v769_v6  ;;  %v251_v0 = vsel %vm802_vm1, %v800_v35, %v232_v58 }
 0x166   :  { %v914_v27 = vadd.f32 %v251_v0, %v775_v8 }
 0x167   :  { %299 = vrot.lane.b32.xlu1 %v908_v59, %s557_s16 }
 0x168   :  { %297 = vrot.lane.b32.xlu0 %v914_v27, %s557_s16 }
 0x16b   :  { %303 = vrot.lane.b32.xlu1 %v809_v52, %s558_s17 }
 0x16c   :  { %301 = vrot.lane.b32.xlu0 %v814_v56, %s558_s17 }
 0x16f   :  { %307 = vrot.lane.b32.xlu1 %v823_v7, %s558_s17 }
 0x170   :  { %305 = vrot.lane.b32.xlu0 %v828_v9, %s558_s17 }
 0x173   :  { %311 = vrot.lane.b32.xlu1 %v837_v13, %s558_s17 }
 0x174   :  { %309 = vrot.lane.b32.xlu0 %v842_v15, %s558_s17 }
 0x177   :  { %315 = vrot.lane.b32.xlu1 %v851_v19, %s558_s17 }
 0x178   :  { %313 = vrot.lane.b32.xlu0 %v856_v21, %s558_s17 }
 0x17b   :  { %319 = vrot.lane.b32.xlu1 %v865_v29, %s558_s17 }
 0x17c   :  { %317 = vrot.lane.b32.xlu0 %v870_v32, %s558_s17 }
 0x17f   :  { %323 = vrot.lane.b32.xlu1 %v879_v38, %s558_s17 }
 0x180   :  { %321 = vrot.lane.b32.xlu0 %v884_v49, %s558_s17 }
 0x183   :  { %327 = vrot.lane.b32.xlu1 %v893_v53, %s558_s17 }
 0x184   :  { %325 = vrot.lane.b32.xlu0 %v898_v55, %s558_s17 }
 0x187   :  { %331 = vrot.lane.b32.xlu1 %v908_v59, %s558_s17 }
 0x188   :  { %329 = vrot.lane.b32.xlu0 %v914_v27, %s558_s17 }
 0x1bd   :  { %v272_v6 = vpop.permute.xlu1 %271 }
 0x1be   :  { %v270_v8 = vpop.permute.xlu0 %269 }
 0x1c1   :  { %v276_v33 = vpop.permute.xlu1 %275 }
 0x1c2   :  { %v274_v35 = vpop.permute.xlu0 %273 }
 0x1c5   :  { %v280_v36 = vpop.permute.xlu1 %279 }
 0x1c6   :  { %v278_v60 = vpop.permute.xlu0 %277 }
 0x1c9   :  { %v284_v4 = vpop.permute.xlu1 %283 }
 0x1ca   :  { %v282_v62 = vpop.permute.xlu0 %281 }
 0x1cd   :  { %v288_v5 = vpop.permute.xlu1 %287 }
 0x1ce   :  { %v286_v63 = vpop.permute.xlu0 %285 }
 0x1d1   :  { %v292_v1 = vpop.permute.xlu1 %291 }
 0x1d2   :  { %v936_v2 = vpop.permute.xlu0 %289 }
 0x1d5   :  { %v938_v3 = vpop.permute.xlu1 %295 }
 0x1d6   :  { %v940_v10 = vpop.permute.xlu0 %293 }
 0x1d9   :  { %v943_v12 = vpop.permute.xlu1 %299 }
 0x1da   :  { %v945_v14 = vpop.permute.xlu0 %297 }
 0x1dd   :  { %v304_v16 = vpop.permute.xlu1 %303 }
 0x1de   :  { %v336_v48 = vsel %vm947_vm2, %v272_v6, %v304_v16  ;;  %v302_v17 = vpop.permute.xlu0 %301 }
 0x1df   :  { %v352_v50 = vadd.f32 %v336_v48, %v809_v52  ;;  %v335_v18 = vsel %vm947_vm2, %v270_v8, %v302_v17 }
 0x1e0   :  { %v351_v61 = vadd.f32 %v335_v18, %v814_v56 }
 0x1e1   :  { %474 = vrcp.f32 %v352_v50  ;;  %v308_v51 = vpop.permute.xlu1 %307 }
 0x1e2   :  { %476 = vrcp.f32 %v351_v61  ;;  %v338_v20 = vsel %vm947_vm2, %v276_v33, %v308_v51  ;;  %v306_v54 = vpop.permute.xlu0 %305 }
 0x1e3   :  { %v354_v24 = vadd.f32 %v338_v20, %v823_v7  ;;  %v337_v57 = vsel %vm947_vm2, %v274_v35, %v306_v54 }
 0x1e4   :  { %v353_v26 = vadd.f32 %v337_v57, %v828_v9 }
 0x1e5   :  { %478 = vrcp.f32 %v354_v24  ;;  %v312_v52 = vpop.permute.xlu1 %311 }
 0x1e6   :  { %480 = vrcp.f32 %v353_v26  ;;  %v340_v56 = vsel %vm947_vm2, %v280_v36, %v312_v52  ;;  %v310_v58 = vpop.permute.xlu0 %309 }
 0x1e7   :  { %v356_v0 = vadd.f32 %v340_v56, %v837_v13  ;;  %v339_v6 = vsel %vm947_vm2, %v278_v60, %v310_v58 }
 0x1e8   :  { %v355_v8 = vadd.f32 %v339_v6, %v842_v15 }
 0x1e9   :  { %482 = vrcp.f32 %v356_v0  ;;  %v316_v7 = vpop.permute.xlu1 %315 }
 0x1ea   :  { %484 = vrcp.f32 %v355_v8  ;;  %v342_v9 = vsel %vm947_vm2, %v284_v4, %v316_v7  ;;  %v314_v33 = vpop.permute.xlu0 %313 }
 0x1eb   :  { %v358_v35 = vadd.f32 %v342_v9, %v851_v19  ;;  %v341_v36 = vsel %vm947_vm2, %v282_v62, %v314_v33 }
 0x1ec   :  { %v357_v11 = vadd.f32 %v341_v36, %v856_v21 }
 0x1ed   :  { %486 = vrcp.f32 %v358_v35  ;;  %v320_v13 = vpop.permute.xlu1 %319 }
 0x1ee   :  { %v475_v16 = vpop.eup %474  ;;  %488 = vrcp.f32 %v357_v11  ;;  %v344_v15 = vsel %vm947_vm2, %v288_v5, %v320_v13  ;;  %v318_v60 = vpop.permute.xlu0 %317 }
 0x1ef   :  { %v477_v48 = vpop.eup %476  ;;  %v384_v17 = vmul.f32 %v475_v16, %v586_v28  ;;  %v360_v4 = vadd.f32 %v344_v15, %v865_v29  ;;  %v343_v19 = vsel %vm947_vm2, %v286_v63, %v318_v60 }
 0x1f0   :  { %v383_v62 = vmul.f32 %v477_v48, %v578_v23  ;;  %v359_v21 = vadd.f32 %v343_v19, %v870_v32 }
 0x1f1   :  { %400 = vst [vmem:[#allocation5 + $0x8] sm:$0xff] %v384_v17  ;;  %490 = vrcp.f32 %v360_v4  ;;  %v324_v50 = vpop.permute.xlu1 %323 }
 0x1f2   :  { %v479_v18 = vpop.eup %478  ;;  %399 = vst [vmem:[#allocation5] sm:$0xff] %v383_v62  ;;  %492 = vrcp.f32 %v359_v21  ;;  %v346_v5 = vsel %vm947_vm2, %v292_v1, %v324_v50  ;;  %v322_v61 = vpop.permute.xlu0 %321 }
 0x1f3   :  { %v481_v28 = vpop.eup %480  ;;  %v386_v29 = vmul.f32 %v479_v18, %v582_v25  ;;  %v362_v51 = vadd.f32 %v346_v5, %v879_v38  ;;  %v345_v23 = vsel %vm947_vm2, %v936_v2, %v322_v61 }
 0x1f4   :  { %v385_v32 = vmul.f32 %v481_v28, %v576_v22  ;;  %v361_v63 = vadd.f32 %v345_v23, %v884_v49 }
 0x1f5   :  { %402 = vst [vmem:[#allocation5 + $0x18] sm:$0xff] %v386_v29  ;;  %494 = vrcp.f32 %v362_v51  ;;  %v328_v20 = vpop.permute.xlu1 %327 }
 0x1f6   :  { %v483_v54 = vpop.eup %482  ;;  %401 = vst [vmem:[#allocation5 + $0x10] sm:$0xff] %v385_v32  ;;  %496 = vrcp.f32 %v361_v63  ;;  %v348_v25 = vsel %vm947_vm2, %v938_v3, %v328_v20  ;;  %v326_v1 = vpop.permute.xlu0 %325 }
 0x1f7   :  { %v485_v38 = vpop.eup %484  ;;  %v388_v24 = vmul.f32 %v483_v54, %v590_v31  ;;  %v364_v2 = vadd.f32 %v348_v25, %v893_v53  ;;  %v347_v22 = vsel %vm947_vm2, %v940_v10, %v326_v1 }
 0x1f8   :  { %v387_v49 = vmul.f32 %v485_v38, %v594_v34  ;;  %v363_v57 = vadd.f32 %v347_v22, %v898_v55 }
 0x1f9   :  { %404 = vst [vmem:[#allocation5 + $0x28] sm:$0xff] %v388_v24  ;;  %498 = vrcp.f32 %v364_v2  ;;  %v332_v26 = vpop.permute.xlu1 %331 }
 0x1fa   :  { %v487_v52 = vpop.eup %486  ;;  %403 = vst [vmem:[#allocation5 + $0x20] sm:$0xff] %v387_v49  ;;  %500 = vrcp.f32 %v363_v57  ;;  %v350_v31 = vsel %vm947_vm2, %v943_v12, %v332_v26  ;;  %v330_v3 = vpop.permute.xlu0 %329 }
 0x1fb   :  { %v489_v53 = vpop.eup %488  ;;  %v390_v56 = vmul.f32 %v487_v52, %v598_v37  ;;  %v366_v10 = vadd.f32 %v350_v31, %v908_v59  ;;  %v349_v34 = vsel %vm947_vm2, %v945_v14, %v330_v3 }
 0x1fc   :  { %v389_v55 = vmul.f32 %v489_v53, %v602_v39  ;;  %v365_v58 = vadd.f32 %v349_v34, %v914_v27 }
 0x1fd   :  { %406 = vst [vmem:[#allocation5 + $0x38] sm:$0xff] %v390_v56  ;;  %502 = vrcp.f32 %v366_v10 }
 0x1fe   :  { %v491_v0 = vpop.eup %490  ;;  %405 = vst [vmem:[#allocation5 + $0x30] sm:$0xff] %v389_v55  ;;  %504 = vrcp.f32 %v365_v58 }
 0x1ff   :  { %v493_v12 = vpop.eup %492  ;;  %v392_v6 = vmul.f32 %v491_v0, %v606_v40 }
 0x200   :  { %v391_v37 = vmul.f32 %v493_v12, %v610_v41 }
 0x201   :  { %408 = vst [vmem:[#allocation5 + $0x48] sm:$0xff] %v392_v6 }
 0x202   :  { %v495_v59 = vpop.eup %494  ;;  %407 = vst [vmem:[#allocation5 + $0x40] sm:$0xff] %v391_v37 }
 0x203   :  { %v497_v8 = vpop.eup %496  ;;  %v394_v14 = vmul.f32 %v495_v59, %v614_v42 }
 0x204   :  { %v393_v39 = vmul.f32 %v497_v8, %v618_v43 }
 0x205   :  { %410 = vst [vmem:[#allocation5 + $0x58] sm:$0xff] %v394_v14 }
 0x206   :  { %v499_v27 = vpop.eup %498  ;;  %409 = vst [vmem:[#allocation5 + $0x50] sm:$0xff] %v393_v39 }
 0x207   :  { %v501_v30 = vpop.eup %500  ;;  %v396_v7 = vmul.f32 %v499_v27, %v622_v44 }
 0x208   :  { %v395_v9 = vmul.f32 %v501_v30, %v626_v45 }
 0x209   :  { %412 = vst [vmem:[#allocation5 + $0x68] sm:$0xff] %v396_v7 }
 0x20a   :  { %v503_v40 = vpop.eup %502  ;;  %411 = vst [vmem:[#allocation5 + $0x60] sm:$0xff] %v395_v9 }
 0x20b   :  { %v505_v41 = vpop.eup %504  ;;  %v398_v33 = vmul.f32 %v503_v40, %v630_v46 }
 0x20c   :  { %v397_v42 = vmul.f32 %v505_v41, %v634_v47 }
 0x20d   :  { %414 = vst [vmem:[#allocation5 + $0x78] sm:$0xff] %v398_v33 }
 0x20e   :  { %413 = vst [vmem:[#allocation5 + $0x70] sm:$0xff] %v397_v42 }
 0x20f   :  { %537 = shalt.err (!%p534_p9)
}
 0x210   :  { %426 = dma.vmem_to_hbm [thread:$0]  %s421_s19, 2048, %s1027_s1, [#allocation4], %s551_s9, %s551_s9, %s552_s10  }
 0x211   :  { %548 = dma.done.wait [#allocation4], 2048  }
 0x212   :  { %549 = vsyncadd [#allocation4], 4294965248 }
 0x213   :  { %430 = vsyncpa [#allocation3], 1 }
 0x214   :  { %431 = vsyncpa [#allocation4], 1 }

</bundles_post_ra>
